<compile_context>
chip_gen: v7x
topology: tpu7x:2x2x1
jax: 0.10.0
libtpu: 0.0.40
codegen_flags: <defaults>
</compile_context>

<pallas_src>
import jax
import jax.numpy as jnp
from jax.experimental import pallas as pl
from jax.experimental.pallas import tpu as pltpu

D_MODEL = 128
SEQ_LEN = 5
VOCAB_SIZE = 50


def embed_pos_kernel(ids_ref, emb_ref, pos_ref, out_ref):
    """out[s, :] = emb_table[ids[b, s], :] + pos[s, :] for the current batch b.

    ids_ref : SMEM (B, S) int32  -- scalar-prefetched token ids
    emb_ref : VMEM (V, D) f32    -- embedding table (resident across the grid)
    pos_ref : VMEM (S, D) f32    -- positional encoding (resident across the grid)
    out_ref : VMEM (S, D) f32    -- output rows for batch b (leading batch dim squeezed)
    """
    b = pl.program_id(0)
    seq = out_ref.shape[0]
    # S is tiny and static -> fully unrolled gather loop.  pos/out row offsets
    # are compile-time constants; only the embedding-row index is dynamic
    # (scalar read from SMEM driving a dynamic sublane slice of the table).
    for s in range(seq):
        tok = ids_ref[b, s]
        # NOTE: out-of-range token ids are not checked here (PyTorch
        # nn.Embedding would raise); inputs are assumed to lie in [0, V).
        out_ref[pl.ds(s, 1), :] = (
            emb_ref[pl.ds(tok, 1), :] + pos_ref[pl.ds(s, 1), :]
        )


def transformer_embed_forward(x_tokens, emb_table, pos_encoder):
    """x_tokens: (B, S) int; emb_table: (V, D) f32; pos_encoder: (1, seq_len, D) f32."""
    B, S = x_tokens.shape
    V, D = emb_table.shape

    ids = x_tokens.astype(jnp.int32)          # (B, S) -> SMEM via scalar prefetch
    pos = pos_encoder[0, :S, :]               # (S, D); no per-batch tiling in HBM

    out = pl.pallas_call(
        embed_pos_kernel,
        out_shape=jax.ShapeDtypeStruct((B, S, D), jnp.float32),
        grid_spec=pltpu.PrefetchScalarGridSpec(
            num_scalar_prefetch=1,            # ids land in SMEM, feed index_maps/kernel
            grid=(B,),
            in_specs=[
                # Embedding table: small (50, 128), kept fully resident in VMEM.
                pl.BlockSpec((V, D), lambda b, ids: (0, 0)),
                # Positional encoding: same (S, D) block for every batch step.
                pl.BlockSpec((S, D), lambda b, ids: (0, 0)),
            ],
            # Leading batch dim squeezed; (S, D) covers full D=128 -> lane-dense stores.
            out_specs=pl.BlockSpec((None, S, D), lambda b, ids: (b, 0, 0)),
        ),
        compiler_params=pltpu.CompilerParams(
            dimension_semantics=("parallel",)),   # batch axis shards across TCs on v7x
    )(ids, emb_table, pos)

    return out


if __name__ == "__main__":
    key = jax.random.PRNGKey(0)
    k_x, k_emb, k_pos = jax.random.split(key, 3)

    B, S = 2, SEQ_LEN
    # Input token ids, as nn.Embedding expects: (B, S) integers in [0, vocab_size)
    x = jax.random.randint(k_x, (B, S), 0, VOCAB_SIZE, dtype=jnp.int32)

    # Deterministic parameter init (shapes from __init__):
    #   nn.Embedding(50, 128).weight ~ N(0, 1)
    emb_table = jax.random.normal(k_emb, (VOCAB_SIZE, D_MODEL), dtype=jnp.float32)
    #   nn.Parameter(torch.zeros(1, 5, 128)) -> small random values so the add
    #   path is actually exercised (zeros would make it a no-op).
    pos_encoder = 0.02 * jax.random.normal(k_pos, (1, SEQ_LEN, D_MODEL),
                                           dtype=jnp.float32)

    out = transformer_embed_forward(x, emb_table, pos_encoder)
    out = jax.block_until_ready(out)

    # Pure-JAX reference: embedding lookup + positional encoding broadcast
    ref = emb_table[x] + pos_encoder[:, :S, :]
    assert out.shape == (B, S, D_MODEL), out.shape
    assert out.dtype == jnp.float32
    assert jnp.allclose(out, ref, atol=1e-5), float(jnp.max(jnp.abs(out - ref)))

    print("KERNEL_OK")
</pallas_src>

<mosaic_0001>
module attributes {stable_mosaic.version = 11 : i64} {
  func.func @embed_pos_kernel(%arg0: i32, %arg1: memref<2x5xi32, #tpu.memory_space<smem>>, %arg2: memref<50x128xf32, #tpu.memory_space<vmem>>, %arg3: memref<5x128xf32, #tpu.memory_space<vmem>>, %arg4: memref<1x5x128xf32, #tpu.memory_space<vmem>>) attributes {dimension_semantics = [#tpu.dimension_semantics<parallel>], iteration_bounds = array<i64: 2>, scalar_prefetch = 1 : i64, scratch_operands = 0 : i64, tpu.core_type = #tpu.core_type<tc>, window_params = [{pipeline_mode = #tpu.pipeline_mode<synchronous>, transform_indices = @transform_0, window_bounds = array<i64: 50, 128>}, {pipeline_mode = #tpu.pipeline_mode<synchronous>, transform_indices = @transform_1, window_bounds = array<i64: 5, 128>}, {transform_indices = @transform_2, window_bounds = array<i64: 1, 5, 128>}]} {
    %0 = arith.index_cast %arg0 : i32 to index
    %c0 = arith.constant 0 : index
    %1 = memref.load %arg1[%0, %c0] : memref<2x5xi32, #tpu.memory_space<smem>>
    %2 = arith.index_cast %1 : i32 to index
    %c0_0 = arith.constant 0 : index
    %3 = vector.load %arg2[%2, %c0_0] : memref<50x128xf32, #tpu.memory_space<vmem>>, vector<1x128xf32>
    %c0_1 = arith.constant 0 : index
    %c0_2 = arith.constant 0 : index
    %4 = vector.load %arg3[%c0_1, %c0_2] : memref<5x128xf32, #tpu.memory_space<vmem>>, vector<1x128xf32>
    %5 = arith.addf %3, %4 : vector<1x128xf32>
    %c0_3 = arith.constant 0 : index
    %c0_4 = arith.constant 0 : index
    %c0_5 = arith.constant 0 : index
    %6 = vector.load %arg4[%c0_3, %c0_4, %c0_5] : memref<1x5x128xf32, #tpu.memory_space<vmem>>, vector<1x1x128xf32>
    %7 = vector.shape_cast %6 : vector<1x1x128xf32> to vector<1x128xf32>
    %8 = vector.shape_cast %5 : vector<1x128xf32> to vector<1x1x128xf32>
    tpu.vector_store %arg4[%c0_3, %c0_4, %c0_5], %8 {strides = array<i32>} : memref<1x5x128xf32, #tpu.memory_space<vmem>>, vector<1x1x128xf32>,
    %9 = arith.index_cast %arg0 : i32 to index
    %c1 = arith.constant 1 : index
    %10 = memref.load %arg1[%9, %c1] : memref<2x5xi32, #tpu.memory_space<smem>>
    %11 = arith.index_cast %10 : i32 to index
    %c0_6 = arith.constant 0 : index
    %12 = vector.load %arg2[%11, %c0_6] : memref<50x128xf32, #tpu.memory_space<vmem>>, vector<1x128xf32>
    %c1_7 = arith.constant 1 : index
    %c0_8 = arith.constant 0 : index
    %13 = vector.load %arg3[%c1_7, %c0_8] : memref<5x128xf32, #tpu.memory_space<vmem>>, vector<1x128xf32>
    %14 = arith.addf %12, %13 : vector<1x128xf32>
    %c0_9 = arith.constant 0 : index
    %c1_10 = arith.constant 1 : index
    %c0_11 = arith.constant 0 : index
    %15 = vector.load %arg4[%c0_9, %c1_10, %c0_11] : memref<1x5x128xf32, #tpu.memory_space<vmem>>, vector<1x1x128xf32>
    %16 = vector.shape_cast %15 : vector<1x1x128xf32> to vector<1x128xf32>
    %17 = vector.shape_cast %14 : vector<1x128xf32> to vector<1x1x128xf32>
    tpu.vector_store %arg4[%c0_9, %c1_10, %c0_11], %17 {strides = array<i32>} : memref<1x5x128xf32, #tpu.memory_space<vmem>>, vector<1x1x128xf32>,
    %18 = arith.index_cast %arg0 : i32 to index
    %c2 = arith.constant 2 : index
    %19 = memref.load %arg1[%18, %c2] : memref<2x5xi32, #tpu.memory_space<smem>>
    %20 = arith.index_cast %19 : i32 to index
    %c0_12 = arith.constant 0 : index
    %21 = vector.load %arg2[%20, %c0_12] : memref<50x128xf32, #tpu.memory_space<vmem>>, vector<1x128xf32>
    %c2_13 = arith.constant 2 : index
    %c0_14 = arith.constant 0 : index
    %22 = vector.load %arg3[%c2_13, %c0_14] : memref<5x128xf32, #tpu.memory_space<vmem>>, vector<1x128xf32>
    %23 = arith.addf %21, %22 : vector<1x128xf32>
    %c0_15 = arith.constant 0 : index
    %c2_16 = arith.constant 2 : index
    %c0_17 = arith.constant 0 : index
    %24 = vector.load %arg4[%c0_15, %c2_16, %c0_17] : memref<1x5x128xf32, #tpu.memory_space<vmem>>, vector<1x1x128xf32>
    %25 = vector.shape_cast %24 : vector<1x1x128xf32> to vector<1x128xf32>
    %26 = vector.shape_cast %23 : vector<1x128xf32> to vector<1x1x128xf32>
    tpu.vector_store %arg4[%c0_15, %c2_16, %c0_17], %26 {strides = array<i32>} : memref<1x5x128xf32, #tpu.memory_space<vmem>>, vector<1x1x128xf32>,
    %27 = arith.index_cast %arg0 : i32 to index
    %c3 = arith.constant 3 : index
    %28 = memref.load %arg1[%27, %c3] : memref<2x5xi32, #tpu.memory_space<smem>>
    %29 = arith.index_cast %28 : i32 to index
    %c0_18 = arith.constant 0 : index
    %30 = vector.load %arg2[%29, %c0_18] : memref<50x128xf32, #tpu.memory_space<vmem>>, vector<1x128xf32>
    %c3_19 = arith.constant 3 : index
    %c0_20 = arith.constant 0 : index
    %31 = vector.load %arg3[%c3_19, %c0_20] : memref<5x128xf32, #tpu.memory_space<vmem>>, vector<1x128xf32>
    %32 = arith.addf %30, %31 : vector<1x128xf32>
    %c0_21 = arith.constant 0 : index
    %c3_22 = arith.constant 3 : index
    %c0_23 = arith.constant 0 : index
    %33 = vector.load %arg4[%c0_21, %c3_22, %c0_23] : memref<1x5x128xf32, #tpu.memory_space<vmem>>, vector<1x1x128xf32>
    %34 = vector.shape_cast %33 : vector<1x1x128xf32> to vector<1x128xf32>
    %35 = vector.shape_cast %32 : vector<1x128xf32> to vector<1x1x128xf32>
    tpu.vector_store %arg4[%c0_21, %c3_22, %c0_23], %35 {strides = array<i32>} : memref<1x5x128xf32, #tpu.memory_space<vmem>>, vector<1x1x128xf32>,
    %36 = arith.index_cast %arg0 : i32 to index
    %c4 = arith.constant 4 : index
    %37 = memref.load %arg1[%36, %c4] : memref<2x5xi32, #tpu.memory_space<smem>>
    %38 = arith.index_cast %37 : i32 to index
    %c0_24 = arith.constant 0 : index
    %39 = vector.load %arg2[%38, %c0_24] : memref<50x128xf32, #tpu.memory_space<vmem>>, vector<1x128xf32>
    %c4_25 = arith.constant 4 : index
    %c0_26 = arith.constant 0 : index
    %40 = vector.load %arg3[%c4_25, %c0_26] : memref<5x128xf32, #tpu.memory_space<vmem>>, vector<1x128xf32>
    %41 = arith.addf %39, %40 : vector<1x128xf32>
    %c0_27 = arith.constant 0 : index
    %c4_28 = arith.constant 4 : index
    %c0_29 = arith.constant 0 : index
    %42 = vector.load %arg4[%c0_27, %c4_28, %c0_29] : memref<1x5x128xf32, #tpu.memory_space<vmem>>, vector<1x1x128xf32>
    %43 = vector.shape_cast %42 : vector<1x1x128xf32> to vector<1x128xf32>
    %44 = vector.shape_cast %41 : vector<1x128xf32> to vector<1x1x128xf32>
    tpu.vector_store %arg4[%c0_27, %c4_28, %c0_29], %44 {strides = array<i32>} : memref<1x5x128xf32, #tpu.memory_space<vmem>>, vector<1x1x128xf32>,
    return
  }
  func.func @transform_0(%arg0: i32, %arg1: memref<2x5xi32, #tpu.memory_space<smem>>) -> (i32, i32) {
    %c0_i32 = arith.constant 0 : i32
    %c0_i32_0 = arith.constant 0 : i32
    %c0_i32_1 = arith.constant 0 : i32
    return %c0_i32, %c0_i32_0 : i32, i32
  }
  func.func @transform_1(%arg0: i32, %arg1: memref<2x5xi32, #tpu.memory_space<smem>>) -> (i32, i32) {
    %c0_i32 = arith.constant 0 : i32
    %c0_i32_0 = arith.constant 0 : i32
    %c0_i32_1 = arith.constant 0 : i32
    return %c0_i32, %c0_i32_0 : i32, i32
  }
  func.func @transform_2(%arg0: i32, %arg1: memref<2x5xi32, #tpu.memory_space<smem>>) -> (i32, i32, i32) {
    %c0_i32 = arith.constant 0 : i32
    %c0_i32_0 = arith.constant 0 : i32
    %c0_i32_1 = arith.constant 0 : i32
    return %arg0, %c0_i32, %c0_i32_0 : i32, i32, i32
  }
}

</mosaic_0001>

<bundles_post_ra>
// kernel: tpu_custom_call.1
= control target key start
LH: loop header
LB: loop body
LE: loop exit
PB: predicated region body
PF: predicated region fallthrough
CT: control target
= control target key end

     0   :  { %s514_s0 = inlined_call_operand.hbm [shape: s32[2,5], index: 0, kind: input, shape index: {}]   ;;  %s515_s1 = inlined_call_operand.hbm [shape: f32[50,128], index: 1, kind: input, shape index: {}]   ;;  %s516_s2 = inlined_call_operand.hbm [shape: f32[5,128], index: 2, kind: input, shape index: {}]   ;;  %s517_s3 = inlined_call_operand.vmem [shape: f32[2,5,128], index: 3, kind: output, shape index: {}]  }
   0x1   :  { %s302_s14 = scalar_lea.hbm %s514_s0, 32 }
   0x2   :  { %p303_p0 = scmp.ne.s32.totalorder %s514_s0, %s302_s14  ;;  %p306_p1 = scmp.lt.u32.totalorder %s302_s14, %s514_s0 }
   0x4   :  { %p308_p2 = pnand %p306_p1, %p303_p0 }
   0x6   :  { %311 = shalt.err (!%p308_p2)  }
   0x7   :  { %s386_s19 = smov [#allocation3]  }
   0x8   :  { %9 = dma.hbm_to_smem %s514_s0, 32, %s386_s19, [#allocation2] }
   0x9   :  { %372 = dma.done.wait [#allocation2], 32 }
   0xa   :  { %373 = vsyncadd [#allocation2], 4294967264 }
   0xb   :  { %11 = sfence }
   0xc   :  { %12 = vsyncpa [#allocation5], 0 }
   0xd   :  { %13 = vsyncpa [#allocation7], 0  ;;  %s423_s22 = smov 0  }
   0xe LB: > { %s429_s23 = sadd.s32 4294967295, %s384_s22   ;;  %p260_p3 = scmp.ge.s32.totalorder %s384_s22, 1  ;;  %s384_s22 = sphi %s423_s22, %s19_s22  }
   0xf   : > { %p92_p4 = scmp.lt.s32.totalorder %s384_s22, 3  ;;  %s387_s0 = smov [#allocation4]  }
  0x10   : > { %s104_s24 = sshll.u32 %s387_s0, 4  ;;  %p518_p6 = scmp.eq.s32.totalorder %s429_s23, 0  ;;  %s105_s24 = int_to_ptr.vmem [resolvable:$true] %s104_s24 }
  0x11   : > { %p433_p5 = pnand %p260_p3, %p92_p4  ;;  %s388_s26 = smov [#allocation6]  }
  0x12   : > { %s118_s27 = sshll.u32 %s388_s26, 4  ;;  %s312_s4 = scalar_lea.hbm %s515_s1, 896  ;;  %s446_s27 = int_to_ptr.vmem [resolvable:$true] %s118_s27 }
  0x13   : > { %s520_s25 = scalar_select %p433_p5, 1, 0 }
  0x14   : > { %p278_p7 = pneg %p433_p5  ;;  %p313_p9 = scmp.ne.s32.totalorder %s515_s1, %s312_s4 }
  0x15   : > { %p319_p13 = scmp.lt.u32.totalorder %s312_s4, %s515_s1 }
  0x16   : > { %p442_p8 = pnand %p518_p6, %p278_p7 }
  0x18   : > { %p314_p10 = pneg %p442_p8 }
  0x1a   : > { %p315_p11 = pnand %p314_p10, %p313_p9 }
  0x1c   : > { %p316_p12 = pneg %p315_p11 }
  0x1e   : > { %p321_p0 = pnand %p319_p13, %p316_p12 }
  0x20   : > { %324 = shalt.err (!%p321_p0)
}
  0x21   : > { %s325_s9 = scalar_lea.vmem %s105_s24, 896  ;;  %p333_p4 = scmp.lt.s32.totalorder %s105_s24, %s105_s24 }
  0x22   : > { %p326_p1 = scmp.ne.s32.totalorder %s105_s24, %s325_s9  ;;  %p334_p7 = scmp.lt.s32.totalorder %s325_s9, %s325_s9 }
  0x24   : > { %p328_p2 = pnand %p326_p1, %p314_p10  ;;  %p335_p6 = por %p334_p7, %p333_p4 }
  0x26   : > { %p329_p3 = pneg %p328_p2 }
  0x28   : > { %p336_p5 = pnand %p335_p6, %p329_p3 }
  0x2a   : > { %339 = shalt.err (!%p336_p5)
}
  0x2b   : > { %s389_s10 = smov 128   ;;  %s390_s11 = smov 8  }
  0x2c   : > { %281 = dma.hbm_to_vmem [thread:$0]  (!%p442_p8), %s515_s1, 896, %s105_s24, [#allocation5], %s389_s10, %s389_s10, %s390_s11  }
  0x2d   : > { %s340_s16 = scalar_lea.hbm %s516_s2, 128 }
  0x2e   : > { %p341_p9 = scmp.ne.s32.totalorder %s516_s2, %s340_s16  ;;  %p347_p11 = scmp.lt.u32.totalorder %s340_s16, %s516_s2 }
  0x30   : > { %p343_p5 = pnand %p341_p9, %p314_p10 }
  0x32   : > { %p344_p6 = pneg %p343_p5 }
  0x34   : > { %p349_p12 = pnand %p347_p11, %p344_p6 }
  0x36   : > { %352 = shalt.err (!%p349_p12)
}
  0x37   : > { %s353_s21 = scalar_lea.vmem %s446_s27, 128  ;;  %p361_p2 = scmp.lt.s32.totalorder %s446_s27, %s446_s27 }
  0x38   : > { %p354_p13 = scmp.ne.s32.totalorder %s446_s27, %s353_s21  ;;  %p362_p3 = scmp.lt.s32.totalorder %s353_s21, %s353_s21 }
  0x3a   : > { %p356_p0 = pnand %p354_p13, %p314_p10  ;;  %p363_p4 = por %p362_p3, %p361_p2 }
  0x3c   : > { %p357_p1 = pneg %p356_p0 }
  0x3e   : > { %p364_p7 = pnand %p363_p4, %p357_p1 }
  0x40   : > { %367 = shalt.err (!%p364_p7)
}
  0x41   : > { %284 = dma.hbm_to_vmem [thread:$0]  (!%p442_p8), %s516_s2, 128, %s446_s27, [#allocation7]  }
  0x42   : > { %p522_p9 = scmp.ne.s32.totalorder %s520_s25, 0 }
  0x43   : > { %p523_p5 = scmp.eq.s32.totalorder (!%p522_p9), %s429_s23, 0 }
  0x44   : > { %131 = sbr.rel (%p522_p9) target bundleno = 96 (0x60), region = 28 }
  0x4b   : > { %375 = dma.done.wait (%p523_p5), [#allocation5], 896   ;;  %p524_p10 = pmov %p523_p5 }
  0x4c   : > { %p525_p6 = pmov %p523_p5 }
  0x4d   : > { %377 = vsyncadd (%p524_p10), [#allocation5], 4294966400 }
  0x4e   : > { %379 = dma.done.wait (%p525_p6), [#allocation7], 128   ;;  %p526_p11 = pmov %p523_p5 }
  0x4f   : > { %p151_p12 = scmp.lt.s32.totalorder %s429_s23, 1  ;;  %s267_s26 = sshll.u32 %s429_s23, 7  ;;  %v159_v0 = vld [vmem:[#allocation6] sm:$0x1]  ;;  %v166_v2 = vld [vmem:[#allocation6 + $0x1] sm:$0x1] }
  0x50   : > { %381 = vsyncadd (%p526_p11), [#allocation7], 4294967168  ;;  %s156_s27 = sld [smem:[#allocation3 + %s267_s26]]  ;;  %s162_s25 = sadd.s32 1, %s267_s26  ;;  %v173_v4 = vld [vmem:[#allocation6 + $0x2] sm:$0x1] }
  0x51   : > { %s528_s23 = smov (!%p151_p12, %s429_s23), 1  ;;  %s163_s28 = sld [smem:[#allocation3 + %s162_s25]]  ;;  %v180_v8 = vld [vmem:[#allocation6 + $0x3] sm:$0x1]  ;;  %v187_v10 = vld [vmem:[#allocation6 + $0x4] sm:$0x1] }
  0x52   : > { %s169_s29 = sadd.s32 2, %s267_s26  ;;  %s266_s4 = sshll.u32 %s528_s23, 3 }
  0x53   : > { %s170_s30 = sld [smem:[#allocation3 + %s169_s29]]  ;;  %s176_s5 = sadd.s32 3, %s267_s26 }
  0x54   : > { %s177_s6 = sld [smem:[#allocation3 + %s176_s5]]  ;;  %s183_s7 = sadd.s32 4, %s267_s26 }
  0x55   : > { %s184_s8 = sld [smem:[#allocation3 + %s183_s7]]  ;;  %s154_s11 = scalar_lea.vmem %s517_s3, %s266_s4 }
  0x56   : > { %s157_s12 = scalar_lea.vmem [#allocation4], %s156_s27 }
  0x57   : > { %v158_v1 = vld [vmem:[%s157_s12] sm:$0x1]  ;;  %s164_s13 = scalar_lea.vmem [#allocation4], %s163_s28 }
  0x58   : > { %v160_v3 = vadd.f32 %v159_v0, %v158_v1  ;;  %v165_v5 = vld [vmem:[%s164_s13] sm:$0x1] }
  0x59   : > { %v167_v6 = vadd.f32 %v166_v2, %v165_v5  ;;  %s171_s14 = scalar_lea.vmem [#allocation4], %s170_s30 }
  0x5a   : > { %161 = vst [vmem:[%s154_s11] sm:$0x1] %v160_v3  ;;  %v172_v7 = vld [vmem:[%s171_s14] sm:$0x1]  ;;  %s178_s23 = scalar_lea.vmem [#allocation4], %s177_s6 }
  0x5b   : > { %v174_v9 = vadd.f32 %v173_v4, %v172_v7  ;;  %168 = vst [vmem:[%s154_s11 + $0x1] sm:$0x1] %v167_v6  ;;  %v179_v11 = vld [vmem:[%s178_s23] sm:$0x1]  ;;  %s185_s15 = scalar_lea.vmem [#allocation4], %s184_s8 }
  0x5c   : > { %v181_v12 = vadd.f32 %v180_v8, %v179_v11  ;;  %v186_v13 = vld [vmem:[%s185_s15] sm:$0x1] }
  0x5d   : > { %175 = vst [vmem:[%s154_s11 + $0x2] sm:$0x1] %v174_v9  ;;  %v188_v14 = vadd.f32 %v187_v10, %v186_v13 }
  0x5e   : > { %182 = vst [vmem:[%s154_s11 + $0x3] sm:$0x1] %v181_v12 }
  0x5f   : > { %189 = vst [vmem:[%s154_s11 + $0x4] sm:$0x1] %v188_v14 }
  0x60 PF: > { %s19_s22 = sadd.s32 1, %s384_s22  }
  0x61   : > { %p16_p8 = scmp.ge.s32.totalorder %s19_s22, 4  }
  0x63   :  { %18 = sbr.rel (!%p16_p8) target bundleno = 14 (0xe), region = 69 }
  0x6a   :  { %209 = vsyncpa [#allocation5], 1 }
  0x6b   :  { %211 = vsyncpa [#allocation5 + $0x1], 1 }
  0x6c   :  { %212 = vsyncpa [#allocation7], 1 }

</bundles_post_ra>
